<compile_context>
chip_gen: v6e
topology: v6e:2x2x1
jax: 0.10.0
libtpu: 0.0.40
codegen_flags: <defaults>
</compile_context>

<pallas_src>
import jax
import jax.numpy as jnp
from jax.experimental import pallas as pl
from jax.experimental.pallas import tpu as pltpu


def _linear_add_relu_kernel(xt_ref, wb_ref, other_ref, o_ref):
    # xt    : (IN, 1)      -- input laid out with IN on sublanes
    # wb    : (IN+1, OUT)  -- rows [0:IN] = W^T, row IN = bias
    # other : (1, OUT)
    xt = xt_ref[...]
    wb = wb_ref[...]
    in_features = xt.shape[0]

    w = wb[:in_features, :]                    # (IN, OUT)
    bias = wb[in_features:in_features + 1, :]  # (1, OUT)

    # VPU elementwise multiply + sublane (XLU) reduce; no MXU involvement.
    acc = jnp.sum(xt * w, axis=0, keepdims=True)          # (1, OUT) f32
    out = acc + bias + other_ref[...]
    o_ref[...] = jnp.maximum(out, 0.0).astype(o_ref.dtype)


def pack_params(w_t, b):
    """Pack weight (IN, OUT) and bias (OUT,) into one (IN+1, OUT) buffer.

    Done once at parameter-setup time so the kernel only sees a single
    static-parameter operand (one DMA instead of two).
    """
    return jnp.concatenate([w_t, b.reshape(1, -1)], axis=0)


def linear_add_relu(x, wb, other):
    """x: (1, IN) f32, wb: (IN+1, OUT) f32 packed [W^T; b], other: (1, OUT) f32."""
    B, IN = x.shape
    OUT = wb.shape[1]
    assert B == 1, "kernel specializes the module's (1, 8) input shape"

    # For B == 1 this transpose is a pure reshape (contiguous 8 elements);
    # it lays IN on the sublane axis so no in-kernel transpose is needed.
    xt = x.reshape(IN, 1)

    return pl.pallas_call(
        _linear_add_relu_kernel,
        out_shape=jax.ShapeDtypeStruct((B, OUT), jnp.float32),
        in_specs=[
            pl.BlockSpec(memory_space=pltpu.MemorySpace.VMEM),
            pl.BlockSpec(memory_space=pltpu.MemorySpace.VMEM),
            pl.BlockSpec(memory_space=pltpu.MemorySpace.VMEM),
        ],
        out_specs=pl.BlockSpec(memory_space=pltpu.MemorySpace.VMEM),
        # Reuse `other`'s HBM buffer for the output (one fewer allocation/DMA).
        input_output_aliases={2: 0},
    )(xt, wb, other)


def reference(x, w_t, b, other):
    return jnp.maximum(x @ w_t + b.reshape(1, -1) + other, 0.0)


if __name__ == "__main__":
    key = jax.random.PRNGKey(0)
    k_x, k_w, k_b, k_o = jax.random.split(key, 4)

    B, IN, OUT = 1, 8, 32

    # Deterministic synthetic parameters matching nn.Linear(8, 32) shapes.
    # PyTorch stores weight as (OUT, IN); we keep it pre-transposed as (IN, OUT).
    bound = 1.0 / jnp.sqrt(IN)
    w_t = jax.random.uniform(k_w, (IN, OUT), jnp.float32, -bound, bound)
    b = jax.random.uniform(k_b, (OUT,), jnp.float32, -bound, bound)

    x1 = jax.random.normal(k_x, (B, IN), jnp.float32)
    other = jax.random.normal(k_o, (B, OUT), jnp.float32)

    # Reference computed before the kernel call (output aliases `other`'s buffer).
    ref = reference(x1, w_t, b, other)

    wb = pack_params(w_t, b)   # one-time parameter packing
    out = linear_add_relu(x1, wb, other)
    out = jax.block_until_ready(out)

    assert out.shape == (B, OUT)
    assert jnp.allclose(out, ref, atol=1e-5, rtol=1e-5), "mismatch vs reference"

    print("KERNEL_OK")
</pallas_src>

<mosaic_0001>
module attributes {stable_mosaic.version = 11 : i64} {
  func.func @_linear_add_relu_kernel(%arg0: memref<8x1xf32, #tpu.memory_space<vmem>>, %arg1: memref<9x32xf32, #tpu.memory_space<vmem>>, %arg2: memref<1x32xf32, #tpu.memory_space<vmem>>, %arg3: memref<1x32xf32, #tpu.memory_space<vmem>>) attributes {dimension_semantics = [], scalar_prefetch = 0 : i64, scratch_operands = 0 : i64, tpu.core_type = #tpu.core_type<tc>} {
    %c0 = arith.constant 0 : index
    %c0_0 = arith.constant 0 : index
    %0 = vector.load %arg0[%c0, %c0_0] : memref<8x1xf32, #tpu.memory_space<vmem>>, vector<8x1xf32>
    %c0_1 = arith.constant 0 : index
    %c0_2 = arith.constant 0 : index
    %1 = vector.load %arg1[%c0_1, %c0_2] : memref<9x32xf32, #tpu.memory_space<vmem>>, vector<9x32xf32>
    %2 = vector.extract_strided_slice %1 {offsets = [0, 0], sizes = [8, 32], strides = [1, 1]} : vector<9x32xf32> to vector<8x32xf32>
    %3 = vector.extract_strided_slice %1 {offsets = [8, 0], sizes = [1, 32], strides = [1, 1]} : vector<9x32xf32> to vector<1x32xf32>
    %4 = vector.broadcast %0 : vector<8x1xf32> to vector<8x32xf32>
    %5 = arith.mulf %4, %2 : vector<8x32xf32>
    %cst = arith.constant dense<0.000000e+00> : vector<32xf32>
    %6 = vector.multi_reduction <add>, %5, %cst [0] : vector<8x32xf32> to vector<32xf32>
    %7 = vector.shape_cast %6 : vector<32xf32> to vector<1x32xf32>
    %8 = arith.addf %7, %3 : vector<1x32xf32>
    %c0_3 = arith.constant 0 : index
    %c0_4 = arith.constant 0 : index
    %9 = vector.load %arg2[%c0_3, %c0_4] : memref<1x32xf32, #tpu.memory_space<vmem>>, vector<1x32xf32>
    %10 = arith.addf %8, %9 : vector<1x32xf32>
    %cst_5 = arith.constant 0.000000e+00 : f32
    %11 = vector.broadcast %cst_5 : f32 to vector<1x32xf32>
    %12 = arith.maximumf %10, %11 : vector<1x32xf32>
    %c0_6 = arith.constant 0 : index
    %c0_7 = arith.constant 0 : index
    %13 = vector.load %arg3[%c0_6, %c0_7] : memref<1x32xf32, #tpu.memory_space<vmem>>, vector<1x32xf32>
    tpu.vector_store %arg3[%c0_6, %c0_7], %12 {strides = array<i32>} : memref<1x32xf32, #tpu.memory_space<vmem>>, vector<1x32xf32>,
    return
  }
}

</mosaic_0001>

<bundles_post_ra>
// kernel: tpu_custom_call.1
= control target key start
LH: loop header
LB: loop body
LE: loop exit
PB: predicated region body
PF: predicated region fallthrough
CT: control target
= control target key end

     0   :  { %8 = vsyncpa [#allocation3], 0  ;;  %s191_s0 = inlined_call_operand.vmem [shape: f32[8,1], index: 0, kind: input, shape index: {}]   ;;  %s192_s1 = inlined_call_operand.hbm [shape: f32[9,32], index: 1, kind: input, shape index: {}]   ;;  %s193_s2 = inlined_call_operand.hbm [shape: f32[1,32], index: 2, kind: input, shape index: {}, may-alias: {2,3}]   ;;  %s194_s3 = inlined_call_operand.hbm [shape: f32[1,32], index: 3, kind: output, shape index: {}, may-alias: {2,3}]  }
   0x1   :  { %9 = vsyncpa [#allocation6], 0 }
   0x2   :  { %10 = vsyncpa [#allocation4], 0  ;;  %s153_s12 = smov [#allocation2]  }
   0x3   :  { %s18_s13 = sshll.u32 %s153_s12, 4  ;;  %s19_s13 = int_to_ptr.vmem [resolvable:$true] %s18_s13 }
   0x4   :  { %s95_s14 = scalar_lea.vmem %s19_s13, 256  ;;  %p100_p1 = scmp.lt.s32.totalorder %s19_s13, %s19_s13 }
   0x5   :  { %p96_p0 = scmp.ne.s32.totalorder %s19_s13, %s95_s14  ;;  %p101_p2 = scmp.lt.s32.totalorder %s95_s14, %s95_s14 }
   0x7   :  { %p102_p3 = por %p101_p2, %p100_p1 }
   0x9   :  { %p103_p4 = pnand %p102_p3, %p96_p0 }
   0xb   :  { %106 = shalt.err (!%p103_p4)
}
   0xc   :  { %s154_s15 = smov 128   ;;  %s155_s16 = smov 8  }
   0xd   :  { %24 = dma.hbm_to_vmem [thread:$0]  %s192_s1, 256, %s19_s13, [#allocation3], %s154_s15, %s154_s15, %s155_s16  }
   0xe   :  { %s156_s19 = smov [#allocation5]  }
   0xf   :  { %s31_s20 = sshll.u32 %s156_s19, 4  ;;  %s32_s20 = int_to_ptr.vmem [resolvable:$true] %s31_s20 }
  0x10   :  { %s115_s21 = scalar_lea.vmem %s32_s20, 16  ;;  %s119_s22 = scalar_lea.vmem %s32_s20, 32 }
  0x11   :  { %p116_p5 = scmp.ne.s32.totalorder %s32_s20, %s115_s21  ;;  %p120_p6 = scmp.lt.s32.totalorder %s32_s20, %s32_s20 }
  0x12   :  { %p121_p7 = scmp.lt.s32.totalorder %s119_s22, %s115_s21 }
  0x14   :  { %p122_p8 = por %p121_p7, %p120_p6 }
  0x16   :  { %p123_p9 = pnand %p122_p8, %p116_p5 }
  0x18   :  { %126 = shalt.err (!%p123_p9)
}
  0x19   :  { %34 = dma.hbm_to_vmem [thread:$0]  %s193_s2, 16, %s32_s20, [#allocation6]  }
  0x1a   :  { %147 = dma.done.wait [#allocation3], 256  }
  0x1b   :  { %148 = vsyncadd [#allocation3], 4294967040 }
  0x1c   :  { %149 = dma.done.wait [#allocation6], 16  }
  0x1d   :  { %150 = vsyncadd [#allocation6], 4294967280  ;;  %v157_v0 = vmov 0   ;;  %v41_v1 = vld [vmem:[%s191_s0] sm:$0xff]  ;;  %vm50_vm0 = vcmask 261120   ;;  %s158_s2 = smov [#allocation7]  }
  0x1e   :  { %86 = vset.pattern.permute.xlu0 %v157_v0  ;;  %v42_v2 = vld [vmem:[#allocation2] sm:$0xff]  ;;  %v43_v11 = vld [vmem:[#allocation2 + $0x8] sm:$0x1]  ;;  %v59_v13 = vld [vmem:[#allocation5] sm:$0x1]  ;;  %s70_s26 = sshll.u32 %s158_s2, 4  ;;  %s71_s26 = int_to_ptr.vmem [resolvable:$true] %s70_s26 }
  0x1f   :  { %46 = vperm.xlu0 %86, %v41_v1   ;;  %vm62_vm1 = vcmask 253952   ;;  %s127_s0 = scalar_lea.vmem %s71_s26, 16  ;;  %s131_s27 = scalar_lea.vmem %s71_s26, 32 }
  0x20   :  { %p128_p10 = scmp.ne.s32.totalorder %s71_s26, %s127_s0  ;;  %p132_p11 = scmp.lt.s32.totalorder %s71_s26, %s71_s26 }
  0x21   :  { %p133_p12 = scmp.lt.s32.totalorder %s131_s27, %s127_s0 }
  0x23   :  { %p134_p13 = por %p133_p12, %p132_p11 }
  0x25   :  { %p135_p0 = pnand %p134_p13, %p128_p10 }
  0x9a   :  { %v47_v3 = vpop.permute.xlu0 %46 }
  0x9b   :  { %v49_v4 = vmul.f32 %v47_v3, %v42_v2 }
  0x9d   :  { %v51_v5 = vsel %vm50_vm0, %v49_v4, 0.0 }
  0x9e   :  { %v52_v6 = vrot.slane %v51_v5, 4 }
  0xa0   :  { %v53_v7 = vadd.f32 %v52_v6, %v51_v5 }
  0xa2   :  { %v54_v8 = vrot.slane %v53_v7, 2 }
  0xa4   :  { %v55_v9 = vadd.f32 %v54_v8, %v53_v7 }
  0xa6   :  { %v56_v10 = vrot.slane %v55_v9, 1 }
  0xa8   :  { %v57_v12 = vadd.f32 %v56_v10, %v55_v9 }
  0xaa   :  { %v58_v14 = vadd.f32 %v57_v12, %v43_v11 }
  0xac   :  { %v60_v15 = vadd.f32 %v59_v13, %v58_v14 }
  0xae   :  { %v61_v16 = vmax.f32 %v60_v15, 0.0 }
  0xb0   :  { %63 = vst.msk [vmem:[#allocation7] sm:$0x1] %vm62_vm1, %v61_v16 }
  0xb1   :  { %138 = shalt.err (!%p135_p0)
}
  0xb2   :  { %73 = dma.vmem_to_hbm [thread:$0]  %s71_s26, 16, %s194_s3, [#allocation4]  }
  0xb3   :  { %151 = dma.done.wait [#allocation4], 16  }
  0xb4   :  { %152 = vsyncadd [#allocation4], 4294967280 }
  0xb5   :  { %77 = vsyncpa [#allocation3], 1 }
  0xb6   :  { %78 = vsyncpa [#allocation6], 1 }
  0xb7   :  { %79 = vsyncpa [#allocation4], 1 }

</bundles_post_ra>
